<compile_context>
chip_gen: v5e
topology: v5e:2x2
jax: 0.10.0
libtpu: 0.0.40
codegen_flags: <defaults>
</compile_context>

<pallas_src>
import functools

import jax
import jax.numpy as jnp
from jax import lax
from jax.experimental import pallas as pl
from jax.experimental.pallas import tpu as pltpu


def _kl_reg_kernel(p_ref, pg_ref, o_ref, acc_ref, *,
                   tps, n_tiles, tb, batch, ragged, has_phantom):
    """Per-split accumulation of sum_{n,b} pg[n] * log(p[n,b]).

    p_ref  : [N, tb] probability tile (native dtype)
    pg_ref : [N, 1]  geometric prior (f32)
    o_ref  : [8, 128] per-split output (scalar broadcast across the block)
    acc_ref: [N, tb] f32 elementwise accumulator (scratch)
    """
    c = pl.program_id(0)          # core split (parallel)
    i = pl.program_id(1)          # batch tile within the split (arbitrary)

    @pl.when(i == 0)
    def _init():
        acc_ref[...] = jnp.zeros_like(acc_ref)

    g = c * tps + i               # global batch-tile index

    def _accumulate():
        # Hot loop: load + cast + log + add only.
        logp = jnp.log(p_ref[...].astype(jnp.float32))
        if ragged:
            # Mask the out-of-range lanes of the last (partial) tile; `batch`
            # is static so this is a couple of free VALU ops under the roofline.
            col = g * tb + lax.broadcasted_iota(jnp.int32, logp.shape, 1)
            logp = jnp.where(col < batch, logp, 0.0)
        acc_ref[...] += logp

    if has_phantom:
        # Uneven 2-way core split: skip tiles past the real tile count.
        pl.when(g < n_tiles)(_accumulate)
    else:
        _accumulate()

    @pl.when(i == tps - 1)
    def _finalize():
        pg = pg_ref[...]                                        # [N, 1] f32
        row = jnp.sum(acc_ref[...], axis=1, keepdims=True)      # single XLU reduce
        # Guard pg == 0 (underflowed prior): 0 * (-inf) would be NaN otherwise;
        # PyTorch's KLDivLoss convention gives 0 contribution for target == 0.
        total = jnp.sum(jnp.where(pg > 0.0, pg * row, 0.0))
        o_ref[...] = jnp.broadcast_to(total.reshape(1, 1), o_ref.shape)


def _pick_tile(n, b, itemsize, max_tile_cols=None):
    """Pick a batch tile width by VMEM byte budget (not a fixed cap)."""
    budget = 14 * 1024 * 1024                 # double-buffered input + f32 acc
    bytes_per_col = n * (2 * itemsize + 4)
    max_cols = max(128, budget // bytes_per_col)
    if max_tile_cols is not None:
        max_cols = max(128, min(max_cols, int(max_tile_cols)))
    if b <= max_cols:
        return b, 1                           # whole batch as one full-dim block
    tb = max(128, (max_cols // 128) * 128)
    n_tiles = -(-b // tb)
    return tb, n_tiles


def make_regularization_loss(lambda_p: float, max_steps: int = 1000, *,
                             max_tile_cols=None,
                             min_pallas_bytes: int = 128 * 1024):
    """Returns loss(p) for p of shape [N, batch] (N <= max_steps)."""
    # Same "parameter" as the PyTorch __init__ loop: p_g[k] = (1-l)^k * l.
    k = jnp.arange(max_steps, dtype=jnp.float32)
    p_g_full = (1.0 - lambda_p) ** k * lambda_p            # [max_steps]

    def loss_fn(p: jax.Array) -> jax.Array:
        n, b = p.shape
        pg = p_g_full[:n]                                  # [N] f32 (may underflow to 0)
        # Prior-entropy term (only N elements) hoisted out of the kernel.
        c_term = jnp.sum(jnp.where(pg > 0.0, pg * jnp.log(pg), 0.0))

        # Tiny inputs: fixed pallas_call + pipeline overhead beats any win;
        # just use the fused XLA expression.
        if p.size * p.dtype.itemsize < min_pallas_bytes:
            p32 = p.astype(jnp.float32)
            acc = jnp.sum(jnp.where(pg[:, None] > 0.0,
                                    pg[:, None] * jnp.log(p32), 0.0))
            return c_term - acc / jnp.float32(b)

        itemsize = p.dtype.itemsize
        tb, n_tiles = _pick_tile(n, b, itemsize, max_tile_cols)
        ragged = (n_tiles > 1) and (b % tb != 0)

        # 2-way TensorCore split on v7x (uneven splits allowed via phantom tiles).
        n_splits = 2 if n_tiles >= 2 else 1
        tps = -(-n_tiles // n_splits)
        has_phantom = n_splits * tps > n_tiles

        pg_k = pg.reshape(n, 1)

        kernel = functools.partial(
            _kl_reg_kernel, tps=tps, n_tiles=n_tiles, tb=tb, batch=b,
            ragged=ragged, has_phantom=has_phantom)

        if has_phantom:
            p_index_map = lambda c, i: (0, jnp.minimum(c * tps + i, n_tiles - 1))
        else:
            p_index_map = lambda c, i: (0, c * tps + i)

        # Explicit VMEM budget: works under v5e's 16 MiB scoped default and
        # stays well inside v7x's 64 MiB physical VMEM.
        vmem_needed = (2 * n * tb * itemsize + n * tb * 4
                       + 2 * n * 4 + 2 * 8 * 128 * 4)
        vmem_limit = int(min(max(vmem_needed + (2 << 20), 16 << 20), 32 << 20))

        out = pl.pallas_call(
            kernel,
            out_shape=jax.ShapeDtypeStruct((8 * n_splits, 128), jnp.float32),
            grid_spec=pltpu.PrefetchScalarGridSpec(
                num_scalar_prefetch=0,
                grid=(n_splits, tps),
                in_specs=[
                    pl.BlockSpec((n, tb), p_index_map),
                    pl.BlockSpec((n, 1), lambda c, i: (0, 0)),
                ],
                out_specs=pl.BlockSpec((8, 128), lambda c, i: (c, 0)),
                scratch_shapes=[pltpu.VMEM((n, tb), jnp.float32)],
            ),
            compiler_params=pltpu.CompilerParams(
                dimension_semantics=("parallel", "arbitrary"),
                vmem_limit_bytes=vmem_limit),
            cost_estimate=pl.CostEstimate(
                flops=2 * p.size,
                transcendentals=p.size,
                bytes_accessed=p.size * itemsize + n * 4
                + 8 * n_splits * 128 * 4),
        )(p, pg_k)

        acc = jnp.sum(out[::8, 0])                 # one partial sum per split
        return c_term - acc / jnp.float32(b)

    return loss_fn


def _reference_loss(p, lambda_p):
    """Pure-JAX reference mirroring the PyTorch module."""
    n, b = p.shape
    k = jnp.arange(n, dtype=jnp.float32)
    p_g = (1.0 - lambda_p) ** k * lambda_p
    pt = p.T.astype(jnp.float32)                          # [B, N]
    pg = jnp.broadcast_to(p_g[None, :], pt.shape)         # [B, N]
    term = jnp.where(pg > 0.0, pg * (jnp.log(pg) - jnp.log(pt)), 0.0)
    return jnp.sum(term) / b


if __name__ == "__main__":
    key = jax.random.PRNGKey(0)
    lambda_p = 0.2

    # (N, B, dtype, max_tile_cols override)
    cases = [
        (8, 2, jnp.float32, None),       # tiny -> plain-JAX fallback path
        (16, 4096, jnp.float32, None),   # whole batch as one block, grid (1, 1)
        (16, 1500, jnp.float32, 512),    # tiling + ragged-tail mask + uneven core split
        (1000, 64, jnp.float32, None),   # lane-narrow full block + pg-underflow guard
        (16, 4096, jnp.bfloat16, None),  # native-dtype (bf16) DMA, f32 accumulate
    ]

    for n_steps, batch, dtype, cap in cases:
        key, sub = jax.random.split(key)
        logits = jax.random.normal(sub, (n_steps, batch), dtype=jnp.float32)
        p = jax.nn.softmax(logits, axis=0).astype(dtype)  # positive, sums to 1 over steps

        loss_fn = make_regularization_loss(lambda_p, max_steps=1000,
                                           max_tile_cols=cap)
        out = loss_fn(p)
        jax.block_until_ready(out)

        ref = _reference_loss(p, lambda_p)
        assert jnp.allclose(out, ref, rtol=2e-4, atol=2e-5), \
            (n_steps, batch, str(dtype), out, ref)

    print("KERNEL_OK")
</pallas_src>

<mosaic_0001>
module attributes {stable_mosaic.version = 11 : i64} {
  func.func @_kl_reg_kernel(%arg0: i32, %arg1: i32, %arg2: memref<16x4096xf32, #tpu.memory_space<vmem>>, %arg3: memref<16x1xf32, #tpu.memory_space<vmem>>, %arg4: memref<8x128xf32, #tpu.memory_space<vmem>>, %arg5: memref<16x4096xf32, #tpu.memory_space<vmem>>) attributes {dimension_semantics = [#tpu.dimension_semantics<parallel>, #tpu.dimension_semantics<arbitrary>], iteration_bounds = array<i64: 1, 1>, scalar_prefetch = 0 : i64, scratch_operands = 1 : i64, tpu.core_type = #tpu.core_type<tc>, window_params = [{transform_indices = @transform_0, window_bounds = array<i64: 16, 4096>}, {pipeline_mode = #tpu.pipeline_mode<synchronous>, transform_indices = @transform_1, window_bounds = array<i64: 16, 1>}, {transform_indices = @transform_2, window_bounds = array<i64: 8, 128>}]} {
    %c0_i32 = arith.constant 0 : i32
    %0 = arith.cmpi eq, %arg1, %c0_i32 : i32
    %1 = arith.extui %0 : i1 to i32
    %c0_i32_0 = arith.constant 0 : i32
    %2 = arith.cmpi ne, %1, %c0_i32_0 : i32
    scf.if %2 {
      %cst = arith.constant 0.000000e+00 : f32
      %11 = vector.broadcast %cst : f32 to vector<16x4096xf32>
      %c0_8 = arith.constant 0 : index
      %c0_9 = arith.constant 0 : index
      %12 = vector.load %arg5[%c0_8, %c0_9] : memref<16x4096xf32, #tpu.memory_space<vmem>>, vector<16x4096xf32>
      tpu.vector_store %arg5[%c0_8, %c0_9], %11 {strides = array<i32>} : memref<16x4096xf32, #tpu.memory_space<vmem>>, vector<16x4096xf32>,
    } else {
    }
    %c0 = arith.constant 0 : index
    %c0_1 = arith.constant 0 : index
    %3 = vector.load %arg2[%c0, %c0_1] : memref<16x4096xf32, #tpu.memory_space<vmem>>, vector<16x4096xf32>
    %4 = math.log %3 : vector<16x4096xf32>
    %c0_2 = arith.constant 0 : index
    %c0_3 = arith.constant 0 : index
    %5 = vector.load %arg5[%c0_2, %c0_3] : memref<16x4096xf32, #tpu.memory_space<vmem>>, vector<16x4096xf32>
    %6 = arith.addf %5, %4 : vector<16x4096xf32>
    %c0_4 = arith.constant 0 : index
    %c0_5 = arith.constant 0 : index
    %7 = vector.load %arg5[%c0_4, %c0_5] : memref<16x4096xf32, #tpu.memory_space<vmem>>, vector<16x4096xf32>
    tpu.vector_store %arg5[%c0_4, %c0_5], %6 {strides = array<i32>} : memref<16x4096xf32, #tpu.memory_space<vmem>>, vector<16x4096xf32>,
    %c0_i32_6 = arith.constant 0 : i32
    %8 = arith.cmpi eq, %arg1, %c0_i32_6 : i32
    %9 = arith.extui %8 : i1 to i32
    %c0_i32_7 = arith.constant 0 : i32
    %10 = arith.cmpi ne, %9, %c0_i32_7 : i32
    scf.if %10 {
      %c0_8 = arith.constant 0 : index
      %c0_9 = arith.constant 0 : index
      %11 = vector.load %arg3[%c0_8, %c0_9] : memref<16x1xf32, #tpu.memory_space<vmem>>, vector<16x1xf32>
      %c0_10 = arith.constant 0 : index
      %c0_11 = arith.constant 0 : index
      %12 = vector.load %arg5[%c0_10, %c0_11] : memref<16x4096xf32, #tpu.memory_space<vmem>>, vector<16x4096xf32>
      %cst = arith.constant dense<0.000000e+00> : vector<16xf32>
      %13 = vector.multi_reduction <add>, %12, %cst [1] : vector<16x4096xf32> to vector<16xf32>
      %14 = vector.shape_cast %13 : vector<16xf32> to vector<16x1xf32>
      %cst_12 = arith.constant 0.000000e+00 : f32
      %15 = vector.broadcast %cst_12 : f32 to vector<16x1xf32>
      %16 = arith.cmpf ogt, %11, %15 : vector<16x1xf32>
      %17 = arith.mulf %11, %14 : vector<16x1xf32>
      %cst_13 = arith.constant 0.000000e+00 : f32
      %18 = vector.broadcast %cst_13 : f32 to vector<16x1xf32>
      %19 = arith.select %16, %17, %18 : vector<16x1xi1>, vector<16x1xf32>
      %20 = vector.shape_cast %19 : vector<16x1xf32> to vector<1x16x1xf32>
      %cst_14 = arith.constant dense<0.000000e+00> : vector<1xf32>
      %21 = vector.multi_reduction <add>, %20, %cst_14 [1, 2] : vector<1x16x1xf32> to vector<1xf32>
      %22 = vector.shape_cast %21 : vector<1xf32> to vector<1x1x1xf32>
      %23 = vector.extract %22[0, 0, 0] : f32 from vector<1x1x1xf32>
      %24 = vector.broadcast %23 : f32 to vector<1x1xf32>
      %25 = vector.shape_cast %24 : vector<1x1xf32> to vector<1x1xf32>
      %26 = vector.broadcast %25 : vector<1x1xf32> to vector<8x128xf32>
      %c0_15 = arith.constant 0 : index
      %c0_16 = arith.constant 0 : index
      %27 = vector.load %arg4[%c0_15, %c0_16] : memref<8x128xf32, #tpu.memory_space<vmem>>, vector<8x128xf32>
      tpu.vector_store %arg4[%c0_15, %c0_16], %26 {strides = array<i32>} : memref<8x128xf32, #tpu.memory_space<vmem>>, vector<8x128xf32>,
    } else {
    }
    return
  }
  func.func @transform_0(%arg0: i32, %arg1: i32) -> (i32, i32) {
    %c1_i32 = arith.constant 1 : i32
    %0 = arith.muli %arg0, %c1_i32 : i32
    %1 = arith.addi %0, %arg1 : i32
    %c0_i32 = arith.constant 0 : i32
    %c0_i32_0 = arith.constant 0 : i32
    return %c0_i32, %1 : i32, i32
  }
  func.func @transform_1(%arg0: i32, %arg1: i32) -> (i32, i32) {
    %c0_i32 = arith.constant 0 : i32
    %c0_i32_0 = arith.constant 0 : i32
    %c0_i32_1 = arith.constant 0 : i32
    return %c0_i32, %c0_i32_0 : i32, i32
  }
  func.func @transform_2(%arg0: i32, %arg1: i32) -> (i32, i32) {
    %c0_i32 = arith.constant 0 : i32
    %c0_i32_0 = arith.constant 0 : i32
    return %arg0, %c0_i32 : i32, i32
  }
}

</mosaic_0001>

<bundles_post_ra>
// kernel: tpu_custom_call.1
= control target key start
LH: loop header
LB: loop body
LE: loop exit
PB: predicated region body
PF: predicated region fallthrough
CT: control target
= control target key end

     0   :  { %7 = vsyncpa [#allocation4], 0  ;;  %s876_s0 = inlined_call_operand.hbm [shape: f32[16,4096], index: 0, kind: input, shape index: {}]   ;;  %s877_s1 = inlined_call_operand.vmem [shape: f32[16,1], index: 1, kind: input, shape index: {}]   ;;  %s878_s2 = inlined_call_operand.hbm [shape: f32[8,128], index: 2, kind: output, shape index: {}]  }
   0x1   :  { %8 = vsyncpa [#allocation5], 0  ;;  %s17_s11 = sshll.u32 %s876_s0, 4  ;;  %s845_s12 = smov [#allocation3]   ;;  %s18_s11 = int_to_ptr.hbm [resolvable:$true] %s17_s11 }
   0x2   :  { %s19_s13 = sshll.u32 %s845_s12, 4  ;;  %s846_s14 = smov 4096   ;;  %s20_s13 = int_to_ptr.vmem [resolvable:$true] %s19_s13 }
   0x3   :  { %s847_s15 = smov 256  }
   0x4   :  { %25 = dma.hbm_to_vmem [thread:$0]  %s18_s11, 8192, %s20_s13, [#allocation4], %s846_s14, %s846_s14, %s847_s15  }
   0x5   :  { %841 = dma.done.wait [#allocation4], 8192  }
   0x6   :  { %842 = vsyncadd [#allocation4], 4294959104  ;;  %v102_v0 = vld [vmem:[#allocation3] sm:$0xff]  ;;  %v103_v1 = vld [vmem:[#allocation3 + $0x8] sm:$0xff]  ;;  %vm627_vm2 = vcmask 7168   ;;  %s649_s22 = sshll.u32 %s878_s2, 4  ;;  %s650_s22 = int_to_ptr.hbm [resolvable:$true] %s649_s22 }
   0x7   :  { %v104_v2 = vld [vmem:[#allocation3 + $0x10] sm:$0xff]  ;;  %v105_v3 = vld [vmem:[#allocation3 + $0x18] sm:$0xff]  ;;  %665 = vlog2.f32 %v102_v0  ;;  %v106_v4 = vld [vmem:[#allocation3 + $0x20] sm:$0xff] }
   0x8   :  { %667 = vlog2.f32 %v103_v1  ;;  %v107_v5 = vld [vmem:[#allocation3 + $0x28] sm:$0xff]  ;;  %v108_v6 = vld [vmem:[#allocation3 + $0x30] sm:$0xff]  ;;  %v109_v8 = vld [vmem:[#allocation3 + $0x38] sm:$0xff] }
   0x9   :  { %669 = vlog2.f32 %v104_v2  ;;  %v110_v12 = vld [vmem:[#allocation3 + $0x40] sm:$0xff]  ;;  %v111_v17 = vld [vmem:[#allocation3 + $0x48] sm:$0xff]  ;;  %v112_v21 = vld [vmem:[#allocation3 + $0x50] sm:$0xff] }
   0xa   :  { %671 = vlog2.f32 %v105_v3  ;;  %v113_v25 = vld [vmem:[#allocation3 + $0x58] sm:$0xff]  ;;  %v114_v29 = vld [vmem:[#allocation3 + $0x60] sm:$0xff]  ;;  %v115_v33 = vld [vmem:[#allocation3 + $0x68] sm:$0xff] }
   0xb   :  { %673 = vlog2.f32 %v106_v4  ;;  %v116_v37 = vld [vmem:[#allocation3 + $0x70] sm:$0xff]  ;;  %v117_v38 = vld [vmem:[#allocation3 + $0x78] sm:$0xff]  ;;  %v118_v42 = vld [vmem:[#allocation3 + $0x80] sm:$0xff] }
   0xc   :  { %675 = vlog2.f32 %v107_v5  ;;  %v119_v43 = vld [vmem:[#allocation3 + $0x88] sm:$0xff]  ;;  %v120_v47 = vld [vmem:[#allocation3 + $0x90] sm:$0xff]  ;;  %v121_v48 = vld [vmem:[#allocation3 + $0x98] sm:$0xff] }
   0xd   :  { %v666_v7 = vpop.eup %665  ;;  %677 = vlog2.f32 %v108_v6  ;;  %v122_v52 = vld [vmem:[#allocation3 + $0xa0] sm:$0xff]  ;;  %v123_v53 = vld [vmem:[#allocation3 + $0xa8] sm:$0xff]  ;;  %v124_v57 = vld [vmem:[#allocation3 + $0xb0] sm:$0xff] }
   0xe   :  { %v668_v9 = vpop.eup %667  ;;  %v167_v10 = vmul.f32 0.6931472, %v666_v7  ;;  %679 = vlog2.f32 %v109_v8  ;;  %v125_v59 = vld [vmem:[#allocation3 + $0xb8] sm:$0xff]  ;;  %v134_v63 = vld [vmem:[#allocation3 + $0x100] sm:$0xff]  ;;  %v135_v3 = vld [vmem:[#allocation3 + $0x108] sm:$0xff] }
   0xf   :  { %v670_v11 = vpop.eup %669  ;;  %v169_v13 = vmul.f32 0.6931472, %v668_v9  ;;  %681 = vlog2.f32 %v110_v12  ;;  %v136_v5 = vld [vmem:[#allocation3 + $0x110] sm:$0xff]  ;;  %v137_v9 = vld [vmem:[#allocation3 + $0x118] sm:$0xff] }
  0x10   :  { %v672_v14 = vpop.eup %671  ;;  %v171_v15 = vmul.f32 0.6931472, %v670_v11  ;;  %683 = vlog2.f32 %v111_v17  ;;  %v138_v11 = vld [vmem:[#allocation3 + $0x120] sm:$0xff] }
  0x11   :  { %v674_v16 = vpop.eup %673  ;;  %v173_v18 = vmul.f32 0.6931472, %v672_v14  ;;  %v555_v19 = vadd.f32 %v169_v13, %v167_v10  ;;  %685 = vlog2.f32 %v112_v21  ;;  %v126_v17 = vld [vmem:[#allocation3 + $0xc0] sm:$0xff]  ;;  %v140_v21 = vld [vmem:[#allocation3 + $0x130] sm:$0xff] }
  0x12   :  { %v676_v20 = vpop.eup %675  ;;  %v175_v22 = vmul.f32 0.6931472, %v674_v16  ;;  %687 = vlog2.f32 %v113_v25 }
  0x13   :  { %v556_v23 = vadd.f32 %v555_v19, %v171_v15  ;;  %v678_v24 = vpop.eup %677  ;;  %v177_v26 = vmul.f32 0.6931472, %v676_v20  ;;  %689 = vlog2.f32 %v114_v29  ;;  %v139_v15 = vld [vmem:[#allocation3 + $0x128] sm:$0xff]  ;;  %v128_v29 = vld [vmem:[#allocation3 + $0xd0] sm:$0xff] }
  0x14   :  { %v680_v28 = vpop.eup %679  ;;  %v179_v30 = vmul.f32 0.6931472, %v678_v24  ;;  %691 = vlog2.f32 %v115_v33 }
  0x15   :  { %v557_v27 = vadd.f32 %v556_v23, %v173_v18  ;;  %v682_v32 = vpop.eup %681  ;;  %v181_v34 = vmul.f32 0.6931472, %v680_v28  ;;  %693 = vlog2.f32 %v116_v37  ;;  %v127_v23 = vld [vmem:[#allocation3 + $0xc8] sm:$0xff]  ;;  %v129_v37 = vld [vmem:[#allocation3 + $0xd8] sm:$0xff] }
  0x16   :  { %v684_v36 = vpop.eup %683  ;;  %v183_v39 = vmul.f32 0.6931472, %v682_v32  ;;  %695 = vlog2.f32 %v117_v38 }
  0x17   :  { %v558_v31 = vadd.f32 %v557_v27, %v175_v22  ;;  %v686_v41 = vpop.eup %685  ;;  %v185_v44 = vmul.f32 0.6931472, %v684_v36  ;;  %697 = vlog2.f32 %v118_v42  ;;  %v141_v27 = vld [vmem:[#allocation3 + $0x138] sm:$0xff]  ;;  %v143_v42 = vld [vmem:[#allocation3 + $0x148] sm:$0xff] }
  0x18   :  { %v688_v46 = vpop.eup %687  ;;  %v187_v49 = vmul.f32 0.6931472, %v686_v41  ;;  %699 = vlog2.f32 %v119_v43 }
  0x19   :  { %v559_v35 = vadd.f32 %v558_v31, %v177_v26  ;;  %v690_v51 = vpop.eup %689  ;;  %v189_v54 = vmul.f32 0.6931472, %v688_v46  ;;  %701 = vlog2.f32 %v120_v47  ;;  %v130_v46 = vld [vmem:[#allocation3 + $0xe0] sm:$0xff] }
  0x1a   :  { %v692_v56 = vpop.eup %691  ;;  %703 = vlog2.f32 %v121_v48  ;;  %v191_v60 = vmul.f32 0.6931472, %v690_v51 }
  0x1b   :  { %v560_v40 = vadd.f32 %v559_v35, %v179_v30  ;;  %v694_v58 = vpop.eup %693  ;;  %705 = vlog2.f32 %v122_v52  ;;  %v193_v1 = vmul.f32 0.6931472, %v692_v56 }
  0x1c   :  { %v696_v62 = vpop.eup %695  ;;  %707 = vlog2.f32 %v123_v53  ;;  %v195_v7 = vmul.f32 0.6931472, %v694_v58  ;;  %v145_v58 = vld [vmem:[#allocation3 + $0x158] sm:$0xff] }
  0x1d   :  { %v561_v45 = vadd.f32 %v560_v40, %v181_v34  ;;  %v698_v0 = vpop.eup %697  ;;  %709 = vlog2.f32 %v124_v57  ;;  %v197_v13 = vmul.f32 0.6931472, %v696_v62  ;;  %v142_v34 = vld [vmem:[#allocation3 + $0x140] sm:$0xff]  ;;  %v132_v62 = vld [vmem:[#allocation3 + $0xf0] sm:$0xff] }
  0x1e   :  { %v700_v4 = vpop.eup %699  ;;  %711 = vlog2.f32 %v125_v59  ;;  %v199_v19 = vmul.f32 0.6931472, %v698_v0 }
  0x1f   :  { %v562_v50 = vadd.f32 %v561_v45, %v183_v39  ;;  %v702_v6 = vpop.eup %701  ;;  %713 = vlog2.f32 %v134_v63  ;;  %v201_v25 = vmul.f32 0.6931472, %v700_v4 }
  0x20   :  { %v704_v10 = vpop.eup %703  ;;  %715 = vlog2.f32 %v135_v3  ;;  %v203_v32 = vmul.f32 0.6931472, %v702_v6  ;;  %v133_v6 = vld [vmem:[#allocation3 + $0xf8] sm:$0xff] }
  0x21   :  { %v563_v55 = vadd.f32 %v562_v50, %v185_v44  ;;  %v706_v12 = vpop.eup %705  ;;  %717 = vlog2.f32 %v136_v5  ;;  %v205_v38 = vmul.f32 0.6931472, %v704_v10  ;;  %v144_v50 = vld [vmem:[#allocation3 + $0x150] sm:$0xff]  ;;  %v147_v10 = vld [vmem:[#allocation3 + $0x168] sm:$0xff] }
  0x22   :  { %v708_v16 = vpop.eup %707  ;;  %719 = vlog2.f32 %v137_v9  ;;  %v207_v47 = vmul.f32 0.6931472, %v706_v12 }
  0x23   :  { %v564_v61 = vadd.f32 %v563_v55, %v187_v49  ;;  %v710_v18 = vpop.eup %709  ;;  %721 = vlog2.f32 %v138_v11  ;;  %v209_v55 = vmul.f32 0.6931472, %v708_v16 }
  0x24   :  { %v712_v22 = vpop.eup %711  ;;  %723 = vlog2.f32 %v139_v15  ;;  %v211_v63 = vmul.f32 0.6931472, %v710_v18 }
  0x25   :  { %v565_v2 = vadd.f32 %v564_v61, %v189_v54  ;;  %v714_v24 = vpop.eup %713  ;;  %725 = vlog2.f32 %v126_v17  ;;  %v131_v54 = vld [vmem:[#allocation3 + $0xe8] sm:$0xff]  ;;  %v148_v17 = vld [vmem:[#allocation3 + $0x170] sm:$0xff] }
  0x26   :  { %v716_v28 = vpop.eup %715  ;;  %v231_v30 = vmul.f32 0.6931472, %v714_v24  ;;  %727 = vlog2.f32 %v140_v21  ;;  %v149_v24 = vld [vmem:[#allocation3 + $0x178] sm:$0xff] }
  0x27   :  { %v566_v8 = vadd.f32 %v565_v2, %v191_v60  ;;  %v718_v31 = vpop.eup %717  ;;  %729 = vlog2.f32 %v127_v23  ;;  %v233_v35 = vmul.f32 0.6931472, %v716_v28  ;;  %v146_v2 = vld [vmem:[#allocation3 + $0x160] sm:$0xff] }
  0x28   :  { %v720_v36 = vpop.eup %719  ;;  %v235_v39 = vmul.f32 0.6931472, %v718_v31  ;;  %731 = vlog2.f32 %v141_v27  ;;  %v150_v31 = vld [vmem:[#allocation3 + $0x180] sm:$0xff] }
  0x29   :  { %v567_v14 = vadd.f32 %v566_v8, %v193_v1  ;;  %v722_v40 = vpop.eup %721  ;;  %733 = vlog2.f32 %v128_v29  ;;  %v237_v43 = vmul.f32 0.6931472, %v720_v36  ;;  %v588_v44 = vadd.f32 %v233_v35, %v231_v30 }
  0x2a   :  { %v724_v45 = vpop.eup %723  ;;  %735 = vlog2.f32 %v142_v34  ;;  %v239_v51 = vmul.f32 0.6931472, %v722_v40 }
  0x2b   :  { %v568_v20 = vadd.f32 %v567_v14, %v195_v7  ;;  %v726_v48 = vpop.eup %725  ;;  %737 = vlog2.f32 %v129_v37  ;;  %v589_v52 = vadd.f32 %v588_v44, %v235_v39  ;;  %v241_v59 = vmul.f32 0.6931472, %v724_v45  ;;  %v152_v44 = vld [vmem:[#allocation3 + $0x190] sm:$0xff] }
  0x2c   :  { %v728_v53 = vpop.eup %727  ;;  %739 = vlog2.f32 %v143_v42  ;;  %v213_v7 = vmul.f32 0.6931472, %v712_v22  ;;  %v215_v14 = vmul.f32 0.6931472, %v726_v48 }
  0x2d   :  { %v569_v26 = vadd.f32 %v568_v20, %v197_v13  ;;  %v730_v56 = vpop.eup %729  ;;  %741 = vlog2.f32 %v130_v46  ;;  %v590_v60 = vadd.f32 %v589_v52, %v237_v43  ;;  %v243_v3 = vmul.f32 0.6931472, %v728_v53 }
  0x2e   :  { %v732_v61 = vpop.eup %731  ;;  %743 = vlog2.f32 %v144_v50  ;;  %v217_v22 = vmul.f32 0.6931472, %v730_v56  ;;  %v153_v50 = vld [vmem:[#allocation3 + $0x198] sm:$0xff]  ;;  %v154_v56 = vld [vmem:[#allocation3 + $0x1a0] sm:$0xff] }
  0x2f   :  { %v570_v33 = vadd.f32 %v569_v26, %v199_v19  ;;  %v734_v0 = vpop.eup %733  ;;  %745 = vlog2.f32 %v131_v54  ;;  %v591_v4 = vadd.f32 %v590_v60, %v239_v51  ;;  %v245_v11 = vmul.f32 0.6931472, %v732_v61 }
  0x30   :  { %v736_v5 = vpop.eup %735  ;;  %747 = vlog2.f32 %v145_v58  ;;  %v219_v29 = vmul.f32 0.6931472, %v734_v0 }
  0x31   :  { %v571_v41 = vadd.f32 %v570_v33, %v201_v25  ;;  %v738_v8 = vpop.eup %737  ;;  %749 = vlog2.f32 %v132_v62  ;;  %v592_v12 = vadd.f32 %v591_v4, %v241_v59  ;;  %v247_v18 = vmul.f32 0.6931472, %v736_v5  ;;  %v155_v62 = vld [vmem:[#allocation3 + $0x1a8] sm:$0xff] }
  0x32   :  { %v740_v13 = vpop.eup %739  ;;  %751 = vlog2.f32 %v146_v2  ;;  %v221_v36 = vmul.f32 0.6931472, %v738_v8  ;;  %v157_v8 = vld [vmem:[#allocation3 + $0x1b8] sm:$0xff] }
  0x33   :  { %v572_v49 = vadd.f32 %v571_v41, %v203_v32  ;;  %v742_v15 = vpop.eup %741  ;;  %753 = vlog2.f32 %v133_v6  ;;  %v593_v19 = vadd.f32 %v592_v12, %v243_v3  ;;  %v249_v25 = vmul.f32 0.6931472, %v740_v13  ;;  %v156_v3 = vld [vmem:[#allocation3 + $0x1b0] sm:$0xff]  ;;  %v158_v12 = vld [vmem:[#allocation3 + $0x1c0] sm:$0xff] }
  0x34   :  { %v744_v20 = vpop.eup %743  ;;  %755 = vlog2.f32 %v147_v10  ;;  %v223_v42 = vmul.f32 0.6931472, %v742_v15 }
  0x35   :  { %v573_v57 = vadd.f32 %v572_v49, %v205_v38  ;;  %v746_v21 = vpop.eup %745  ;;  %v594_v26 = vadd.f32 %v593_v19, %v245_v11  ;;  %757 = vlog2.f32 %v148_v17  ;;  %v251_v32 = vmul.f32 0.6931472, %v744_v20  ;;  %v151_v38 = vld [vmem:[#allocation3 + $0x188] sm:$0xff]  ;;  %v160_v20 = vld [vmem:[#allocation3 + $0x1d0] sm:$0xff] }
  0x36   :  { %v748_v27 = vpop.eup %747  ;;  %759 = vlog2.f32 %v149_v24  ;;  %v225_v48 = vmul.f32 0.6931472, %v746_v21  ;;  %v161_v24 = vld [vmem:[#allocation3 + $0x1d8] sm:$0xff] }
  0x37   :  { %v574_v1 = vadd.f32 %v573_v57, %v207_v47  ;;  %v750_v28 = vpop.eup %749  ;;  %v595_v33 = vadd.f32 %v594_v26, %v247_v18  ;;  %v253_v39 = vmul.f32 0.6931472, %v748_v27  ;;  %761 = vlog2.f32 %v150_v31 }
  0x38   :  { %v752_v34 = vpop.eup %751  ;;  %763 = vlog2.f32 %v151_v38  ;;  %v227_v54 = vmul.f32 0.6931472, %v750_v28  ;;  %v162_v28 = vld [vmem:[#allocation3 + $0x1e0] sm:$0xff] }
  0x39   :  { %v575_v9 = vadd.f32 %v574_v1, %v209_v55  ;;  %v754_v35 = vpop.eup %753  ;;  %v596_v40 = vadd.f32 %v595_v33, %v249_v25  ;;  %v255_v45 = vmul.f32 0.6931472, %v752_v34  ;;  %765 = vlog2.f32 %v152_v44 }
  0x3a   :  { %v756_v41 = vpop.eup %755  ;;  %767 = vlog2.f32 %v153_v50  ;;  %v229_v60 = vmul.f32 0.6931472, %v754_v35 }
  0x3b   :  { %v576_v16 = vadd.f32 %v575_v9, %v211_v63  ;;  %v597_v46 = vadd.f32 %v596_v40, %v251_v32  ;;  %v758_v47 = vpop.eup %757  ;;  %v257_v51 = vmul.f32 0.6931472, %v756_v41  ;;  %769 = vlog2.f32 %v154_v56  ;;  %v163_v32 = vld [vmem:[#allocation3 + $0x1e8] sm:$0xff]  ;;  %v165_v40 = vld [vmem:[#allocation3 + $0x1f8] sm:$0xff] }
  0x3c   :  { %v760_v53 = vpop.eup %759  ;;  %v259_v57 = vmul.f32 0.6931472, %v758_v47  ;;  %771 = vlog2.f32 %v155_v62 }
  0x3d   :  { %v577_v23 = vadd.f32 %v576_v16, %v213_v7  ;;  %v598_v52 = vadd.f32 %v597_v46, %v253_v39  ;;  %v762_v59 = vpop.eup %761  ;;  %v261_v63 = vmul.f32 0.6931472, %v760_v53  ;;  %773 = vlog2.f32 %v156_v3  ;;  %v159_v16 = vld [vmem:[#allocation3 + $0x1c8] sm:$0xff] }
  0x3e   :  { %v764_v1 = vpop.eup %763  ;;  %v263_v4 = vmul.f32 0.6931472, %v762_v59  ;;  %775 = vlog2.f32 %v157_v8 }
  0x3f   :  { %v578_v30 = vadd.f32 %v577_v23, %v215_v14  ;;  %v599_v58 = vadd.f32 %v598_v52, %v255_v45  ;;  %v766_v6 = vpop.eup %765  ;;  %v265_v9 = vmul.f32 0.6931472, %v764_v1  ;;  %777 = vlog2.f32 %v158_v12  ;;  %v490_v1 = vld [vmem:[%s877_s1 + $0x8] sm:$0xff] }
  0x40   :  { %v768_v11 = vpop.eup %767  ;;  %v267_v13 = vmul.f32 0.6931472, %v766_v6  ;;  %779 = vlog2.f32 %v159_v16  ;;  %vm622_vm1 = vcmp.gt.f32.partialorder %v490_v1, 0.0 }
  0x41   :  { %v579_v37 = vadd.f32 %v578_v30, %v217_v22  ;;  %v600_v0 = vadd.f32 %v599_v58, %v257_v51  ;;  %v770_v15 = vpop.eup %769  ;;  %v269_v17 = vmul.f32 0.6931472, %v768_v11  ;;  %781 = vlog2.f32 %v160_v20 }
  0x42   :  { %v772_v19 = vpop.eup %771  ;;  %v271_v21 = vmul.f32 0.6931472, %v770_v15  ;;  %783 = vlog2.f32 %v161_v24 }
  0x43   :  { %v580_v43 = vadd.f32 %v579_v37, %v219_v29  ;;  %v601_v5 = vadd.f32 %v600_v0, %v259_v57  ;;  %v774_v23 = vpop.eup %773  ;;  %v273_v25 = vmul.f32 0.6931472, %v772_v19  ;;  %785 = vlog2.f32 %v162_v28 }
  0x44   :  { %v776_v27 = vpop.eup %775  ;;  %v275_v29 = vmul.f32 0.6931472, %v774_v23  ;;  %787 = vlog2.f32 %v163_v32 }
  0x45   :  { %v581_v49 = vadd.f32 %v580_v43, %v221_v36  ;;  %v602_v10 = vadd.f32 %v601_v5, %v261_v63  ;;  %v778_v31 = vpop.eup %777  ;;  %v277_v33 = vmul.f32 0.6931472, %v776_v27  ;;  %v164_v36 = vld [vmem:[#allocation3 + $0x1f0] sm:$0xff]  ;;  %v489_v63 = vld [vmem:[%s877_s1] sm:$0xff]  ;;  %s848_s1 = smov [#allocation6]  }
  0x46   :  { %v780_v35 = vpop.eup %779  ;;  %v279_v37 = vmul.f32 0.6931472, %v778_v31  ;;  %789 = vlog2.f32 %v164_v36  ;;  %vm621_vm0 = vcmp.gt.f32.partialorder %v489_v63, 0.0  ;;  %s647_s19 = sshll.u32 %s848_s1, 4  ;;  %s648_s19 = int_to_ptr.vmem [resolvable:$true] %s647_s19 }
  0x47   :  { %v582_v55 = vadd.f32 %v581_v49, %v223_v42  ;;  %v603_v14 = vadd.f32 %v602_v10, %v263_v4  ;;  %v782_v39 = vpop.eup %781  ;;  %v281_v41 = vmul.f32 0.6931472, %v780_v35  ;;  %791 = vlog2.f32 %v165_v40 }
  0x48   :  { %v784_v43 = vpop.eup %783  ;;  %v283_v44 = vmul.f32 0.6931472, %v782_v39 }
  0x49   :  { %v583_v61 = vadd.f32 %v582_v55, %v225_v48  ;;  %v604_v18 = vadd.f32 %v603_v14, %v265_v9  ;;  %v786_v46 = vpop.eup %785  ;;  %v285_v47 = vmul.f32 0.6931472, %v784_v43 }
  0x4a   :  { %v788_v49 = vpop.eup %787  ;;  %v287_v50 = vmul.f32 0.6931472, %v786_v46 }
  0x4b   :  { %v584_v2 = vadd.f32 %v583_v61, %v227_v54  ;;  %v605_v22 = vadd.f32 %v604_v18, %v267_v13  ;;  %v289_v53 = vmul.f32 0.6931472, %v788_v49 }
  0x4c   :  { %v790_v52 = vpop.eup %789 }
  0x4d   :  { %v585_v7 = vadd.f32 %v584_v2, %v229_v60  ;;  %v606_v26 = vadd.f32 %v605_v22, %v269_v17  ;;  %v792_v55 = vpop.eup %791  ;;  %v291_v56 = vmul.f32 0.6931472, %v790_v52 }
  0x4e   :  { %v293_v58 = vmul.f32 0.6931472, %v792_v55 }
  0x4f   :  { %586 = vadd.xlane.f32.xlu0 %v585_v7  ;;  %v607_v30 = vadd.f32 %v606_v26, %v271_v21 }
  0x51   :  { %v608_v34 = vadd.f32 %v607_v30, %v273_v25 }
  0x53   :  { %v609_v38 = vadd.f32 %v608_v34, %v275_v29 }
  0x55   :  { %v610_v42 = vadd.f32 %v609_v38, %v277_v33 }
  0x57   :  { %v611_v45 = vadd.f32 %v610_v42, %v279_v37 }
  0x59   :  { %v612_v48 = vadd.f32 %v611_v45, %v281_v41 }
  0x5b   :  { %v613_v51 = vadd.f32 %v612_v48, %v283_v44 }
  0x5d   :  { %v614_v54 = vadd.f32 %v613_v51, %v285_v47 }
  0x5f   :  { %v615_v57 = vadd.f32 %v614_v54, %v287_v50 }
  0x61   :  { %v616_v59 = vadd.f32 %v615_v57, %v289_v53 }
  0x63   :  { %v617_v60 = vadd.f32 %v616_v59, %v291_v56 }
  0x65   :  { %v618_v61 = vadd.f32 %v617_v60, %v293_v58 }
  0x67   :  { %619 = vadd.xlane.f32.xlu0 %v618_v61 }
  0xc2   :  { %v587_v62 = vpop.xlane.xlu0 %586 }
  0xc3   :  { %v623_v0 = vmul.f32 %v587_v62, %v489_v63 }
  0xc5   :  { %v625_v4 = vsel %vm621_vm0, %v623_v0, 0.0 }
  0xc6   :  { %v628_v6 = vsel %vm627_vm2, %v625_v4, 0.0 }
  0xda   :  { %v620_v2 = vpop.xlane.xlu0 %619 }
  0xdb   :  { %v624_v3 = vmul.f32 %v620_v2, %v490_v1 }
  0xdd   :  { %v626_v5 = vsel %vm622_vm1, %v624_v3, 0.0 }
  0xde   :  { %v629_v7 = vsel %vm627_vm2, %v626_v5, 0.0 }
  0xdf   :  { %v630_v8 = vadd.f32 %v629_v7, %v628_v6 }
  0xe1   :  { %631 = vadd.xlane.f32.xlu1 %v630_v8 }
 0x154   :  { %v632_v9 = vpop.xlane.xlu1 %631 }
 0x155   :  { %v633_v10 = vrot.slane %v632_v9, 4 }
 0x157   :  { %v634_v11 = vadd.f32 %v633_v10, %v632_v9 }
 0x159   :  { %v635_v12 = vrot.slane %v634_v11, 2 }
 0x15b   :  { %v636_v13 = vadd.f32 %v635_v12, %v634_v11 }
 0x15d   :  { %v637_v14 = vrot.slane %v636_v13, 1 }
 0x15f   :  { %v638_v15 = vadd.f32 %v637_v14, %v636_v13 }
 0x161   :  { %659 = vpush %v638_v15 }
 0x192   :  { %s660_s23 = spop %659 }
 0x193   :  { %v640_v16 = vstv %s660_s23 }
 0x194   :  { %641 = vst [vmem:[#allocation6] sm:$0xff] %v640_v16 }
 0x195   :  { %652 = dma.vmem_to_hbm [thread:$0]  %s648_s19, 128, %s650_s22, [#allocation5]  }
 0x196   :  { %843 = dma.done.wait [#allocation5], 128  }
 0x197   :  { %844 = vsyncadd [#allocation5], 4294967168 }
 0x198   :  { %657 = vsyncpa [#allocation4], 1 }
 0x199   :  { %658 = vsyncpa [#allocation5], 1 }

</bundles_post_ra>
